<compile_context>
chip_gen: v7x
topology: tpu7x:2x2x1
jax: 0.10.0
libtpu: 0.0.40
codegen_flags: <defaults>
</compile_context>

<pallas_src>
import functools
import numpy as np

import jax
import jax.numpy as jnp
from jax import lax
from jax.experimental import pallas as pl
from jax.experimental.pallas import tpu as pltpu

TM_CAP, TN_CAP, TK_CAP = 256, 256, 512


def _round_up(v, m):
    return ((v + m - 1) // m) * m


def _pick_tile(dim_padded, cap):
    """Largest multiple of 128 <= cap that divides dim_padded (dim_padded % 128 == 0)."""
    t = min(cap, dim_padded)
    while dim_padded % t != 0:
        t -= 128
    return t


# ----------------------------------------------------------------------------
# Pallas kernels
# ----------------------------------------------------------------------------
def _mm_kernel(a_ref, b_ref, sb_ref, o_ref, acc_ref, *, relu):
    @pl.when(pl.program_id(2) == 0)
    def _():
        acc_ref[...] = jnp.zeros_like(acc_ref)

    acc_ref[...] += jnp.dot(a_ref[...], b_ref[...],
                            preferred_element_type=jnp.float32)

    @pl.when(pl.program_id(2) == pl.num_programs(2) - 1)
    def _():
        sb = sb_ref[...]                       # (2, TN): row0=scale, row1=shift
        r = acc_ref[...] * sb[0:1, :] + sb[1:2, :]
        if relu:
            r = jnp.maximum(r, 0.0)
        o_ref[...] = r


def _mm_res_kernel(a_ref, b_ref, sb_ref, r_ref, o_ref, acc_ref, *, relu):
    @pl.when(pl.program_id(2) == 0)
    def _():
        acc_ref[...] = jnp.zeros_like(acc_ref)

    acc_ref[...] += jnp.dot(a_ref[...], b_ref[...],
                            preferred_element_type=jnp.float32)

    @pl.when(pl.program_id(2) == pl.num_programs(2) - 1)
    def _():
        sb = sb_ref[...]
        r = acc_ref[...] * sb[0:1, :] + sb[1:2, :] + r_ref[...]
        if relu:
            r = jnp.maximum(r, 0.0)
        o_ref[...] = r


def fused_matmul(a, b_p, sb_p, n_out, *, relu, residual=None):
    """out = relu?( (a @ B) * scale + shift [+ residual] )

    a        : (M, K) f32 (cast to bf16 inside)
    b_p      : (Kp, Np) bf16, pre-padded packed weights
    sb_p     : (2, Np) f32, row0 = scale, row1 = shift
    residual : optional (M, n_out) f32, added before the ReLU
    """
    M, K = a.shape
    Kp, Np = b_p.shape
    Mp = _round_up(M, 128)
    TM = _pick_tile(Mp, TM_CAP)
    TN = _pick_tile(Np, TN_CAP)
    TK = _pick_tile(Kp, TK_CAP)

    a_bf = a.astype(jnp.bfloat16)
    if Mp != M or Kp != K:
        a_bf = jnp.pad(a_bf, ((0, Mp - M), (0, Kp - K)))

    in_specs = [
        pl.BlockSpec((TM, TK), lambda i, j, k: (i, k)),
        pl.BlockSpec((TK, TN), lambda i, j, k: (k, j)),
        pl.BlockSpec((2, TN), lambda i, j, k: (0, j)),
    ]
    args = [a_bf, b_p, sb_p]

    if residual is not None:
        r_p = residual.astype(jnp.float32)
        if Mp != M or Np != n_out:
            r_p = jnp.pad(r_p, ((0, Mp - M), (0, Np - n_out)))
        in_specs.append(pl.BlockSpec((TM, TN), lambda i, j, k: (i, j)))
        args.append(r_p)
        kern = functools.partial(_mm_res_kernel, relu=relu)
    else:
        kern = functools.partial(_mm_kernel, relu=relu)

    grid = (Mp // TM, Np // TN, Kp // TK)
    out = pl.pallas_call(
        kern,
        out_shape=jax.ShapeDtypeStruct((Mp, Np), jnp.float32),
        grid_spec=pltpu.PrefetchScalarGridSpec(
            num_scalar_prefetch=0,
            grid=grid,
            in_specs=in_specs,
            out_specs=pl.BlockSpec((TM, TN), lambda i, j, k: (i, j)),
            scratch_shapes=[pltpu.VMEM((TM, TN), jnp.float32)],
        ),
        compiler_params=pltpu.CompilerParams(
            dimension_semantics=("parallel", "parallel", "arbitrary"),
            vmem_limit_bytes=48 * 1024 * 1024),
    )(*args)
    return out[:M, :n_out]


# ----------------------------------------------------------------------------
# Conv wrappers (im2col glue + Pallas matmul)
# ----------------------------------------------------------------------------
def conv2d(x, p, *, stride=1, padding=0, dilation=1, relu=False, residual=None):
    """x: NHWC f32; p: packed conv params from _pack_conv."""
    n, h, wid, cin = x.shape
    kh, kw, cout = p['kh'], p['kw'], p['cout']
    oh = (h + 2 * padding - dilation * (kh - 1) - 1) // stride + 1
    ow = (wid + 2 * padding - dilation * (kw - 1) - 1) // stride + 1

    if kh == 1 and kw == 1 and padding == 0:
        xs = x if stride == 1 else x[:, ::stride, ::stride, :]
        a = xs.reshape(n * oh * ow, cin)
    else:
        xp = jnp.pad(x, ((0, 0), (padding, padding), (padding, padding), (0, 0)))
        cols = []
        for ki in range(kh):
            for kj in range(kw):
                hs, ws = ki * dilation, kj * dilation
                patch = lax.slice(
                    xp,
                    (0, hs, ws, 0),
                    (n, hs + (oh - 1) * stride + 1, ws + (ow - 1) * stride + 1, cin),
                    (1, stride, stride, 1))
                cols.append(patch)
        a = jnp.concatenate(cols, axis=-1).reshape(n * oh * ow, kh * kw * cin)

    res = None if residual is None else residual.reshape(n * oh * ow, cout)
    out = fused_matmul(a, p['b'], p['sb'], cout, relu=relu, residual=res)
    return out.reshape(n, oh, ow, cout)


def conv_transpose2d(x, p, *, relu=True):
    """ConvTranspose2d(k=3, stride=2, padding=1) via 4-phase sub-pixel
    decomposition (no zero insertion).  p from _pack_convT_phases."""
    n, h, w, cin = x.shape
    cout = p['cout']
    oh, ow = 2 * h - 1, 2 * w - 1

    # phase (even row, even col): 1 tap
    a00 = x.reshape(n * h * w, cin)
    y00 = fused_matmul(a00, p['p00']['b'], p['p00']['sb'], cout,
                       relu=relu).reshape(n, h, w, cout)
    # phase (even row, odd col): taps x[.,n], x[.,n+1]
    a01 = jnp.concatenate([x[:, :, :w - 1, :], x[:, :, 1:, :]],
                          axis=-1).reshape(n * h * (w - 1), 2 * cin)
    y01 = fused_matmul(a01, p['p01']['b'], p['p01']['sb'], cout,
                       relu=relu).reshape(n, h, w - 1, cout)
    # phase (odd row, even col): taps x[m,.], x[m+1,.]
    a10 = jnp.concatenate([x[:, :h - 1, :, :], x[:, 1:, :, :]],
                          axis=-1).reshape(n * (h - 1) * w, 2 * cin)
    y10 = fused_matmul(a10, p['p10']['b'], p['p10']['sb'], cout,
                       relu=relu).reshape(n, h - 1, w, cout)
    # phase (odd row, odd col): 4 taps
    a11 = jnp.concatenate([x[:, :h - 1, :w - 1, :], x[:, :h - 1, 1:, :],
                           x[:, 1:, :w - 1, :], x[:, 1:, 1:, :]],
                          axis=-1).reshape(n * (h - 1) * (w - 1), 4 * cin)
    y11 = fused_matmul(a11, p['p11']['b'], p['p11']['sb'], cout,
                       relu=relu).reshape(n, h - 1, w - 1, cout)

    out = jnp.zeros((n, oh, ow, cout), jnp.float32)
    out = out.at[:, 0::2, 0::2, :].set(y00)
    out = out.at[:, 0::2, 1::2, :].set(y01)
    out = out.at[:, 1::2, 0::2, :].set(y10)
    out = out.at[:, 1::2, 1::2, :].set(y11)
    return out


# ----------------------------------------------------------------------------
# Pool / resize glue
# ----------------------------------------------------------------------------
def maxpool_k2s2p1_ceil(x):
    """nn.MaxPool2d(kernel_size=2, stride=2, padding=1, ceil_mode=True) on NHWC."""
    n, h, w, c = x.shape

    def _out(sz):
        o = int(np.ceil((sz + 2 * 1 - 2) / 2.0)) + 1
        if (o - 1) * 2 >= sz + 1:  # last window starts inside padding -> drop
            o -= 1
        return o

    oh, ow = _out(h), _out(w)
    pad_h = max(0, (oh - 1) * 2 + 2 - h - 1)
    pad_w = max(0, (ow - 1) * 2 + 2 - w - 1)
    return lax.reduce_window(
        x, -np.inf, lax.max,
        window_dimensions=(1, 2, 2, 1),
        window_strides=(1, 2, 2, 1),
        padding=((0, 0), (1, pad_h), (1, pad_w), (0, 0)))


def bilinear_resize(x, out_h, out_w):
    """F.interpolate(mode='bilinear', align_corners=False) on NHWC."""
    n, h, w, c = x.shape

    def _idx(out_sz, in_sz):
        scale = in_sz / out_sz
        s = (np.arange(out_sz, dtype=np.float64) + 0.5) * scale - 0.5
        s = np.maximum(s, 0.0)
        i0 = np.floor(s).astype(np.int32)
        i0 = np.minimum(i0, in_sz - 1)
        i1 = np.minimum(i0 + 1, in_sz - 1)
        lam = (s - i0).astype(np.float32)
        return i0, i1, lam

    y0, y1, ly = _idx(out_h, h)
    x0, x1, lx = _idx(out_w, w)
    ly = jnp.asarray(ly)[None, :, None, None]
    lx = jnp.asarray(lx)[None, None, :, None]
    top = x[:, y0, :, :] * (1.0 - ly) + x[:, y1, :, :] * ly
    out = top[:, :, x0, :] * (1.0 - lx) + top[:, :, x1, :] * lx
    return out


# ----------------------------------------------------------------------------
# Parameter init + packing (deterministic, synthetic; weights pre-padded once)
# ----------------------------------------------------------------------------
class KeyGen:
    def __init__(self, seed):
        self._key = jax.random.PRNGKey(seed)

    def __call__(self):
        self._key, k = jax.random.split(self._key)
        return k


def _pack_conv(w_pt, scale, shift):
    """w_pt: PyTorch layout (Cout, Cin, kh, kw) -> bf16 (Kp, Np) matmul B,
    plus merged (2, Np) scale/shift."""
    cout, cin, kh, kw = w_pt.shape
    B = jnp.transpose(w_pt, (2, 3, 1, 0)).reshape(kh * kw * cin, cout)
    K, N = B.shape
    Kp, Np = _round_up(K, 128), _round_up(N, 128)
    b_p = jnp.pad(B, ((0, Kp - K), (0, Np - N))).astype(jnp.bfloat16)
    sb = jnp.stack([scale, shift], axis=0).astype(jnp.float32)
    sb_p = jnp.pad(sb, ((0, 0), (0, Np - N)))
    return {'b': b_p, 'sb': sb_p, 'cout': cout, 'cin': cin, 'kh': kh, 'kw': kw}


def _init_conv_w(kg, cin, cout, k):
    fan_in = cin * k * k
    return jax.random.normal(kg(), (cout, cin, k, k), jnp.float32) * np.sqrt(2.0 / fan_in)


def _bn_fold(kg, cout):
    gamma = 1.0 + 0.1 * jax.random.normal(kg(), (cout,), jnp.float32)
    beta = 0.1 * jax.random.normal(kg(), (cout,), jnp.float32)
    rmean = 0.1 * jax.random.normal(kg(), (cout,), jnp.float32)
    rvar = 1.0 + 0.1 * jax.random.uniform(kg(), (cout,), jnp.float32)
    eps = 1e-5
    scale = gamma / jnp.sqrt(rvar + eps)
    shift = beta - rmean * scale
    return scale, shift


def init_cbr(kg, cin, cout, k):
    """_ConvBnReLU: conv (no bias) + BN folded (inference mode)."""
    w = _init_conv_w(kg, cin, cout, k)
    scale, shift = _bn_fold(kg, cout)
    return _pack_conv(w, scale, shift)


def init_conv_bias(kg, cin, cout, k):
    """Plain Conv2d with bias (ConRu / final convs)."""
    w = _init_conv_w(kg, cin, cout, k)
    bound = 1.0 / np.sqrt(cin * k * k)
    b = (jax.random.uniform(kg(), (cout,), jnp.float32) * 2.0 - 1.0) * bound
    return _pack_conv(w, jnp.ones((cout,), jnp.float32), b)


def init_conv_bias_bn(kg, cin, cout, k):
    """Conv2d(bias) + BatchNorm2d folded (conv_up00 first two blocks)."""
    w = _init_conv_w(kg, cin, cout, k)
    bound = 1.0 / np.sqrt(cin * k * k)
    b = (jax.random.uniform(kg(), (cout,), jnp.float32) * 2.0 - 1.0) * bound
    scale, shift_bn = _bn_fold(kg, cout)
    shift = scale * b + shift_bn
    return _pack_conv(w, scale, shift)


def init_convT_bias(kg, cin, cout, k):
    """ConvTranspose2d(k=3, s=2, p=1) with bias; packed into 4 phase matmuls."""
    assert k == 3
    fan_in = cin * k * k
    w = jax.random.normal(kg(), (cin, cout, k, k), jnp.float32) * np.sqrt(2.0 / fan_in)
    bound = 1.0 / np.sqrt(fan_in)
    bias = (jax.random.uniform(kg(), (cout,), jnp.float32) * 2.0 - 1.0) * bound

    ones = jnp.ones((cout,), jnp.float32)

    def tap(ky, kx):
        return w[:, :, ky, kx]                      # (cin, cout)

    def pack(taps):
        B = jnp.concatenate(taps, axis=0)           # (ntaps*cin, cout)
        K, N = B.shape
        Kp, Np = _round_up(K, 128), _round_up(N, 128)
        b_p = jnp.pad(B, ((0, Kp - K), (0, Np - N))).astype(jnp.bfloat16)
        sb = jnp.stack([ones, bias], axis=0).astype(jnp.float32)
        sb_p = jnp.pad(sb, ((0, 0), (0, Np - N)))
        return {'b': b_p, 'sb': sb_p}

    # out[2m,2n]     = x[m,n]   @ w[1,1]
    # out[2m,2n+1]   = x[m,n]   @ w[1,2] + x[m,n+1]   @ w[1,0]
    # out[2m+1,2n]   = x[m,n]   @ w[2,1] + x[m+1,n]   @ w[0,1]
    # out[2m+1,2n+1] = x[m,n]@w[2,2] + x[m,n+1]@w[2,0] + x[m+1,n]@w[0,2] + x[m+1,n+1]@w[0,0]
    return {
        'p00': pack([tap(1, 1)]),
        'p01': pack([tap(1, 2), tap(1, 0)]),
        'p10': pack([tap(2, 1), tap(0, 1)]),
        'p11': pack([tap(2, 2), tap(2, 0), tap(0, 2), tap(0, 0)]),
        'cout': cout,
    }


def init_reslayer(kg, n_layers, in_ch, out_ch, stride, dilation, multi_grids=None):
    if multi_grids is None:
        multi_grids = [1] * n_layers
    assert len(multi_grids) == n_layers
    blocks = []
    for i in range(n_layers):
        b_in = in_ch if i == 0 else out_ch
        b_stride = stride if i == 0 else 1
        b_dil = dilation * multi_grids[i]
        downsample = (i == 0)
        mid = out_ch // 4  # _BOTTLENECK_EXPANSION
        blk = {
            'reduce': init_cbr(kg, b_in, mid, 1),
            'conv3x3': init_cbr(kg, mid, mid, 3),
            'increase': init_cbr(kg, mid, out_ch, 1),
            'stride': b_stride,
            'dilation': b_dil,
            'downsample': downsample,
        }
        if downsample:
            blk['shortcut'] = init_cbr(kg, b_in, out_ch, 1)
        blocks.append(blk)
    return blocks


def init_pmnet(seed, n_blocks, atrous_rates, multi_grids, output_stride):
    kg = KeyGen(seed)
    if output_stride == 8:
        s, d = [1, 2, 1, 1], [1, 1, 2, 4]
    elif output_stride == 16:
        s, d = [1, 2, 2, 1], [1, 1, 1, 2]
    else:
        raise ValueError(output_stride)
    ch = [64 * 2 ** p for p in range(6)]

    P = {}
    P['stem_conv1'] = init_cbr(kg, 2, ch[0], 7)                      # layer1
    P['layer2'] = init_reslayer(kg, n_blocks[0], ch[0], ch[2], s[0], d[0])
    P['layer3'] = init_reslayer(kg, n_blocks[1], ch[2], ch[3], s[1], d[1])
    P['layer4'] = init_reslayer(kg, n_blocks[2], ch[3], ch[3], s[2], d[2])
    P['layer5'] = init_reslayer(kg, n_blocks[3], ch[3], ch[4], s[3], d[3], multi_grids)

    aspp = {'rates': list(atrous_rates), 'c0': init_cbr(kg, ch[4], 256, 1)}
    for i, _r in enumerate(atrous_rates):
        aspp['c{}'.format(i + 1)] = init_cbr(kg, ch[4], 256, 3)
    aspp['imagepool'] = init_cbr(kg, ch[4], 256, 1)
    P['aspp'] = aspp

    concat_ch = 256 * (len(atrous_rates) + 2)
    P['fc1'] = init_cbr(kg, concat_ch, 512, 1)
    P['reduce'] = init_cbr(kg, 256, 256, 1)

    P['conv_up5'] = init_conv_bias(kg, 512, 512, 3)
    P['conv_up4'] = init_convT_bias(kg, 512 + 512, 512, 3)
    P['conv_up3'] = init_convT_bias(kg, 512 + 512, 256, 3)
    P['conv_up2'] = init_conv_bias(kg, 256 + 256, 256, 3)
    P['conv_up1'] = init_conv_bias(kg, 256 + 256, 256, 3)
    P['conv_up0'] = init_conv_bias(kg, 256 + 64, 128, 3)

    P['up00_1'] = init_conv_bias_bn(kg, 128 + 2, 64, 3)
    P['up00_2'] = init_conv_bias_bn(kg, 64, 64, 3)
    P['up00_3'] = init_conv_bias(kg, 64, 1, 3)
    return P


# ----------------------------------------------------------------------------
# Module application
# ----------------------------------------------------------------------------
def apply_bottleneck(blk, x):
    h = conv2d(x, blk['reduce'], stride=blk['stride'], padding=0, dilation=1, relu=True)
    h = conv2d(h, blk['conv3x3'], stride=1, padding=blk['dilation'],
               dilation=blk['dilation'], relu=True)
    if blk['downsample']:
        sc = conv2d(x, blk['shortcut'], stride=blk['stride'], padding=0,
                    dilation=1, relu=False)
    else:
        sc = x
    # residual add + ReLU fused into the 'increase' conv epilogue
    return conv2d(h, blk['increase'], stride=1, padding=0, dilation=1,
                  relu=True, residual=sc)


def apply_reslayer(blocks, x):
    for blk in blocks:
        x = apply_bottleneck(blk, x)
    return x


def apply_aspp(p, x):
    n, h, w, _ = x.shape
    outs = [conv2d(x, p['c0'], stride=1, padding=0, dilation=1, relu=True)]
    for i, r in enumerate(p['rates']):
        outs.append(conv2d(x, p['c{}'.format(i + 1)], stride=1,
                           padding=r, dilation=r, relu=True))
    pooled = jnp.mean(x, axis=(1, 2), keepdims=True)          # AdaptiveAvgPool2d(1)
    hpool = conv2d(pooled, p['imagepool'], stride=1, padding=0, dilation=1, relu=True)
    hpool = bilinear_resize(hpool, h, w)
    outs.append(hpool)
    return jnp.concatenate(outs, axis=-1)


def pmnet_forward(P, x_nchw):
    x = jnp.transpose(x_nchw, (0, 2, 3, 1)).astype(jnp.float32)   # -> NHWC
    in_h, in_w = x.shape[1], x.shape[2]

    # layer1 (_Stem): 7x7/s2 ConvBnReLU + MaxPool(k=in_ch=2, s=2, p=1, ceil)
    x1 = conv2d(x, P['stem_conv1'], stride=2, padding=3, dilation=1, relu=True)
    x1 = maxpool_k2s2p1_ceil(x1)

    x2 = apply_reslayer(P['layer2'], x1)
    x3 = conv2d(x2, P['reduce'], stride=1, padding=0, dilation=1, relu=True)
    x4 = apply_reslayer(P['layer3'], x3)
    x5 = apply_reslayer(P['layer4'], x4)
    x6 = apply_reslayer(P['layer5'], x5)
    x7 = apply_aspp(P['aspp'], x6)
    x8 = conv2d(x7, P['fc1'], stride=1, padding=0, dilation=1, relu=True)

    xup5 = conv2d(x8, P['conv_up5'], stride=1, padding=1, dilation=1, relu=True)
    xup5 = jnp.concatenate([xup5, x5], axis=-1)
    xup4 = conv_transpose2d(xup5, P['conv_up4'], relu=True)
    xup4 = jnp.concatenate([xup4, x4], axis=-1)
    xup3 = conv_transpose2d(xup4, P['conv_up3'], relu=True)
    xup3 = jnp.concatenate([xup3, x3], axis=-1)
    xup2 = conv2d(xup3, P['conv_up2'], stride=1, padding=1, dilation=1, relu=True)
    xup2 = jnp.concatenate([xup2, x2], axis=-1)
    xup1 = conv2d(xup2, P['conv_up1'], stride=1, padding=1, dilation=1, relu=True)
    xup1 = jnp.concatenate([xup1, x1], axis=-1)
    xup0 = conv2d(xup1, P['conv_up0'], stride=1, padding=1, dilation=1, relu=True)
    xup0 = bilinear_resize(xup0, in_h, in_w)
    xup0 = jnp.concatenate([xup0, x], axis=-1)

    h = conv2d(xup0, P['up00_1'], stride=1, padding=1, dilation=1, relu=True)
    h = conv2d(h, P['up00_2'], stride=1, padding=1, dilation=1, relu=True)
    out = conv2d(h, P['up00_3'], stride=1, padding=1, dilation=1, relu=False)

    return jnp.transpose(out, (0, 3, 1, 2))                      # -> NCHW


# ----------------------------------------------------------------------------
if __name__ == "__main__":
    # Small config: PMNet(n_blocks=[1,1,1,1], atrous_rates=[2], multi_grids=[1],
    #                     output_stride=16)
    params = init_pmnet(0, n_blocks=[1, 1, 1, 1], atrous_rates=[2],
                        multi_grids=[1], output_stride=16)

    key = jax.random.PRNGKey(0)
    x = jax.random.normal(key, (2, 2, 16, 16), jnp.float32)  # NCHW, in_ch=2

    out = pmnet_forward(params, x)
    out = jax.block_until_ready(out)
    assert out.shape == (2, 1, 16, 16), out.shape
    assert out.dtype == jnp.float32
    assert bool(jnp.all(jnp.isfinite(out)))
    print("KERNEL_OK")
</pallas_src>

<mosaic_0001>
module attributes {stable_mosaic.version = 11 : i64} {
  func.func @_mm_kernel(%arg0: i32, %arg1: i32, %arg2: i32, %arg3: memref<128x128xbf16, #tpu.memory_space<vmem>>, %arg4: memref<128x128xbf16, #tpu.memory_space<vmem>>, %arg5: memref<2x128xf32, #tpu.memory_space<vmem>>, %arg6: memref<128x128xf32, #tpu.memory_space<vmem>>, %arg7: memref<128x128xf32, #tpu.memory_space<vmem>>) attributes {dimension_semantics = [#tpu.dimension_semantics<parallel>, #tpu.dimension_semantics<parallel>, #tpu.dimension_semantics<arbitrary>], iteration_bounds = array<i64: 1, 1, 1>, scalar_prefetch = 0 : i64, scratch_operands = 1 : i64, tpu.core_type = #tpu.core_type<tc>, window_params = [{transform_indices = @transform_0, window_bounds = array<i64: 128, 128>}, {transform_indices = @transform_1, window_bounds = array<i64: 128, 128>}, {transform_indices = @transform_2, window_bounds = array<i64: 2, 128>}, {transform_indices = @transform_3, window_bounds = array<i64: 128, 128>}]} {
    %c0_i32 = arith.constant 0 : i32
    %0 = arith.cmpi eq, %arg2, %c0_i32 : i32
    %1 = arith.extui %0 : i1 to i32
    %c0_i32_0 = arith.constant 0 : i32
    %2 = arith.cmpi ne, %1, %c0_i32_0 : i32
    scf.if %2 {
      %cst_10 = arith.constant 0.000000e+00 : f32
      %12 = vector.broadcast %cst_10 : f32 to vector<128x128xf32>
      %c0_11 = arith.constant 0 : index
      %c0_12 = arith.constant 0 : index
      %13 = vector.load %arg7[%c0_11, %c0_12] : memref<128x128xf32, #tpu.memory_space<vmem>>, vector<128x128xf32>
      tpu.vector_store %arg7[%c0_11, %c0_12], %12 {strides = array<i32>} : memref<128x128xf32, #tpu.memory_space<vmem>>, vector<128x128xf32>,
    } else {
    }
    %c0 = arith.constant 0 : index
    %c0_1 = arith.constant 0 : index
    %3 = vector.load %arg7[%c0, %c0_1] : memref<128x128xf32, #tpu.memory_space<vmem>>, vector<128x128xf32>
    %c0_2 = arith.constant 0 : index
    %c0_3 = arith.constant 0 : index
    %4 = vector.load %arg3[%c0_2, %c0_3] : memref<128x128xbf16, #tpu.memory_space<vmem>>, vector<128x128xbf16>
    %c0_4 = arith.constant 0 : index
    %c0_5 = arith.constant 0 : index
    %5 = vector.load %arg4[%c0_4, %c0_5] : memref<128x128xbf16, #tpu.memory_space<vmem>>, vector<128x128xbf16>
    %cst = arith.constant dense<0.000000e+00> : vector<128x128xf32>
    %6 = tpu.matmul %4, %5, %cst {dimension_numbers = #tpu.dot_dimension_numbers<[1], [0], [0], [1], [0, 0, 1, 1], [], []>} : vector<128x128xbf16>, vector<128x128xbf16>, vector<128x128xf32> -> vector<128x128xf32>
    %7 = arith.addf %3, %6 : vector<128x128xf32>
    %c0_6 = arith.constant 0 : index
    %c0_7 = arith.constant 0 : index
    %8 = vector.load %arg7[%c0_6, %c0_7] : memref<128x128xf32, #tpu.memory_space<vmem>>, vector<128x128xf32>
    tpu.vector_store %arg7[%c0_6, %c0_7], %7 {strides = array<i32>} : memref<128x128xf32, #tpu.memory_space<vmem>>, vector<128x128xf32>,
    %c0_i32_8 = arith.constant 0 : i32
    %9 = arith.cmpi eq, %arg2, %c0_i32_8 : i32
    %10 = arith.extui %9 : i1 to i32
    %c0_i32_9 = arith.constant 0 : i32
    %11 = arith.cmpi ne, %10, %c0_i32_9 : i32
    scf.if %11 {
      %c0_10 = arith.constant 0 : index
      %c0_11 = arith.constant 0 : index
      %12 = vector.load %arg5[%c0_10, %c0_11] : memref<2x128xf32, #tpu.memory_space<vmem>>, vector<2x128xf32>
      %c0_12 = arith.constant 0 : index
      %c0_13 = arith.constant 0 : index
      %13 = vector.load %arg7[%c0_12, %c0_13] : memref<128x128xf32, #tpu.memory_space<vmem>>, vector<128x128xf32>
      %14 = vector.extract_strided_slice %12 {offsets = [0, 0], sizes = [1, 128], strides = [1, 1]} : vector<2x128xf32> to vector<1x128xf32>
      %15 = vector.broadcast %14 : vector<1x128xf32> to vector<128x128xf32>
      %16 = arith.mulf %13, %15 : vector<128x128xf32>
      %17 = vector.extract_strided_slice %12 {offsets = [1, 0], sizes = [1, 128], strides = [1, 1]} : vector<2x128xf32> to vector<1x128xf32>
      %18 = vector.broadcast %17 : vector<1x128xf32> to vector<128x128xf32>
      %19 = arith.addf %16, %18 : vector<128x128xf32>
      %cst_14 = arith.constant 0.000000e+00 : f32
      %20 = vector.broadcast %cst_14 : f32 to vector<128x128xf32>
      %21 = arith.maximumf %19, %20 : vector<128x128xf32>
      %c0_15 = arith.constant 0 : index
      %c0_16 = arith.constant 0 : index
      %22 = vector.load %arg6[%c0_15, %c0_16] : memref<128x128xf32, #tpu.memory_space<vmem>>, vector<128x128xf32>
      tpu.vector_store %arg6[%c0_15, %c0_16], %21 {strides = array<i32>} : memref<128x128xf32, #tpu.memory_space<vmem>>, vector<128x128xf32>,
    } else {
    }
    return
  }
  func.func @transform_0(%arg0: i32, %arg1: i32, %arg2: i32) -> (i32, i32) {
    %c0_i32 = arith.constant 0 : i32
    return %arg0, %arg2 : i32, i32
  }
  func.func @transform_1(%arg0: i32, %arg1: i32, %arg2: i32) -> (i32, i32) {
    %c0_i32 = arith.constant 0 : i32
    return %arg2, %arg1 : i32, i32
  }
  func.func @transform_2(%arg0: i32, %arg1: i32, %arg2: i32) -> (i32, i32) {
    %c0_i32 = arith.constant 0 : i32
    %c0_i32_0 = arith.constant 0 : i32
    return %c0_i32, %arg1 : i32, i32
  }
  func.func @transform_3(%arg0: i32, %arg1: i32, %arg2: i32) -> (i32, i32) {
    %c0_i32 = arith.constant 0 : i32
    return %arg0, %arg1 : i32, i32
  }
}

</mosaic_0001>

<bundles_post_ra>
// kernel: tpu_custom_call.1
= control target key start
LH: loop header
LB: loop body
LE: loop exit
PB: predicated region body
PF: predicated region fallthrough
CT: control target
= control target key end

     0   :  { %8 = vsyncpa [#allocation4], 0  ;;  %s706_s0 = inlined_call_operand.hbm [shape: bf16[128,128], index: 0, kind: input, shape index: {}]   ;;  %s707_s1 = inlined_call_operand.hbm [shape: bf16[128,128], index: 1, kind: input, shape index: {}]   ;;  %s708_s2 = inlined_call_operand.vmem [shape: f32[2,128], index: 2, kind: input, shape index: {}]   ;;  %s709_s3 = inlined_call_operand.hbm [shape: f32[128,128], index: 3, kind: output, shape index: {}]  }
   0x1   :  { %9 = vsyncpa [#allocation7], 0 }
   0x2   :  { %10 = vsyncpa [#allocation5], 0  ;;  %s622_s12 = smov [#allocation3]   ;;  %s550_s16 = scalar_lea.hbm %s706_s0, 1024 }
   0x3   :  { %s16_s13 = sshll.u32 %s622_s12, 4  ;;  %p551_p0 = scmp.ne.s32.totalorder %s706_s0, %s550_s16  ;;  %s17_s13 = int_to_ptr.vmem [resolvable:$true] %s16_s13 }
   0x4   :  { %p554_p1 = scmp.lt.u32.totalorder %s550_s16, %s706_s0 }
   0x6   :  { %p556_p2 = pnand %p554_p1, %p551_p0 }
   0x8   :  { %559 = shalt.err (!%p556_p2)
}
   0x9   :  { %s560_s21 = scalar_lea.vmem %s17_s13, 1024  ;;  %p565_p4 = scmp.lt.s32.totalorder %s17_s13, %s17_s13 }
   0xa   :  { %p561_p3 = scmp.ne.s32.totalorder %s17_s13, %s560_s21  ;;  %p566_p5 = scmp.lt.s32.totalorder %s560_s21, %s560_s21 }
   0xc   :  { %p567_p6 = por %p566_p5, %p565_p4 }
   0xe   :  { %p568_p7 = pnand %p567_p6, %p561_p3 }
  0x10   :  { %571 = shalt.err (!%p568_p7)
}
  0x11   :  { %s623_s22 = smov 64   ;;  %s624_s23 = smov 4  }
  0x12   :  { %22 = dma.hbm_to_vmem [thread:$0]  %s706_s0, 1024, %s17_s13, [#allocation4], %s623_s22, %s623_s22, %s624_s23  }
  0x13   :  { %s625_s26 = smov [#allocation6]   ;;  %s572_s30 = scalar_lea.hbm %s707_s1, 1024 }
  0x14   :  { %s28_s27 = sshll.u32 %s625_s26, 4  ;;  %p573_p8 = scmp.ne.s32.totalorder %s707_s1, %s572_s30  ;;  %s29_s27 = int_to_ptr.vmem [resolvable:$true] %s28_s27 }
  0x15   :  { %p576_p9 = scmp.lt.u32.totalorder %s572_s30, %s707_s1 }
  0x17   :  { %p578_p10 = pnand %p576_p9, %p573_p8 }
  0x19   :  { %581 = shalt.err (!%p578_p10)
}
  0x1a   :  { %s582_s8 = scalar_lea.vmem %s29_s27, 1024  ;;  %p587_p12 = scmp.lt.s32.totalorder %s29_s27, %s29_s27 }
  0x1b   :  { %p583_p11 = scmp.ne.s32.totalorder %s29_s27, %s582_s8  ;;  %p588_p13 = scmp.lt.s32.totalorder %s582_s8, %s582_s8 }
  0x1d   :  { %p589_p0 = por %p588_p13, %p587_p12 }
  0x1f   :  { %p590_p1 = pnand %p589_p0, %p583_p11 }
  0x21   :  { %593 = shalt.err (!%p590_p1)
}
  0x22   :  { %34 = dma.hbm_to_vmem [thread:$0]  %s707_s1, 1024, %s29_s27, [#allocation7], %s623_s22, %s623_s22, %s624_s23  }
  0x23   :  { %616 = dma.done.wait [#allocation4], 1024  }
  0x24   :  { %617 = vsyncadd [#allocation4], 4294966272 }
  0x25   :  { %618 = dma.done.wait [#allocation7], 1024  }
  0x26   :  { %619 = vsyncadd [#allocation7], 4294966272  ;;  %v534_v0 = vld [vmem:[#allocation6] sm:$0xff]   ;;  %v535_v1 = vld [vmem:[#allocation6 + $0x8] sm:$0xff]   ;;  %v357_v16 = vlaneseq }
  0x27   :  { %479 = vmatprep.subr.bf16.mxu0 %v534_v0  ;;  %511 = vmatprep.subr.bf16.mxu1 %v534_v0  ;;  %v536_v2 = vld [vmem:[#allocation6 + $0x10] sm:$0xff]   ;;  %v537_v3 = vld [vmem:[#allocation6 + $0x18] sm:$0xff]   ;;  %v542_v4 = vld [vmem:[#allocation3] sm:$0xff]  }
  0x28   :  { %480 = vmatpush3.bf16.msra.mxu0 %v534_v0  ;;  %519 = vmatpush3.bf16.msra.mxu1 %v534_v0  ;;  %v543_v5 = vld [vmem:[#allocation3 + $0x20] sm:$0xff]   ;;  %v539_v7 = vld [vmem:[#allocation6 + $0x28] sm:$0xff]   ;;  %v540_v8 = vld [vmem:[#allocation6 + $0x30] sm:$0xff]   ;;  %v358_v17 = vshrl.u32 %v357_v16, 7 }
  0x29   :  { %481 = vmatprep.subr.bf16.mxu0 %v535_v1  ;;  %512 = vmatprep.subr.bf16.mxu1 %v535_v1  ;;  %v538_v6 = vld [vmem:[#allocation6 + $0x20] sm:$0xff]   ;;  %v541_v9 = vld [vmem:[#allocation6 + $0x38] sm:$0xff]   ;;  %v544_v10 = vld [vmem:[#allocation3 + $0x8] sm:$0xff]  }
  0x2a   :  { %495 = vmatprep.mubr.bf16.mxu0 %v542_v4  ;;  %503 = vmatprep.mubr.bf16.mxu1 %v543_v5  ;;  %v545_v11 = vld [vmem:[#allocation3 + $0x28] sm:$0xff]   ;;  %v546_v12 = vld [vmem:[#allocation3 + $0x10] sm:$0xff]   ;;  %v548_v14 = vld [vmem:[#allocation3 + $0x18] sm:$0xff]   ;;  %v359_v18 = vsub.s32 0, %v358_v17  ;;  %v379_v20 = vsub.s32 1, %v358_v17 }
  0x2b   :  { %v547_v13 = vld [vmem:[#allocation3 + $0x30] sm:$0xff]   ;;  %v549_v15 = vld [vmem:[#allocation3 + $0x38] sm:$0xff]   ;;  %v340_v19 = vld [vmem:[%s708_s2] sm:$0x3]  ;;  %s626_s2 = smov [#allocation8]  }
  0x2c   :  { %482 = vmatpush3.bf16.msra.mxu0 %v535_v1  ;;  %520 = vmatpush3.bf16.msra.mxu1 %v535_v1  ;;  %v360_v21 = vrot.slane %v340_v19, %v359_v18  ;;  %v676_v22 = vrot.slane %v340_v19, %v379_v20  ;;  %s434_s11 = sshll.u32 %s626_s2, 4  ;;  %s435_s11 = int_to_ptr.vmem [resolvable:$true] %s434_s11 }
  0x2d   :  { %483 = vmatprep.subr.bf16.mxu0 %v536_v2  ;;  %513 = vmatprep.subr.bf16.mxu1 %v536_v2  ;;  %s594_s12 = scalar_lea.vmem %s435_s11, 2048  ;;  %p599_p3 = scmp.lt.s32.totalorder %s435_s11, %s435_s11 }
  0x2e   :  { %p595_p2 = scmp.ne.s32.totalorder %s435_s11, %s594_s12  ;;  %p600_p4 = scmp.lt.s32.totalorder %s594_s12, %s594_s12 }
  0x30   :  { %484 = vmatpush3.bf16.msra.mxu0 %v536_v2  ;;  %521 = vmatpush3.bf16.msra.mxu1 %v536_v2  ;;  %p601_p5 = por %p600_p4, %p599_p3 }
  0x31   :  { %485 = vmatprep.subr.bf16.mxu0 %v537_v3  ;;  %514 = vmatprep.subr.bf16.mxu1 %v537_v3 }
  0x32   :  { %p602_p6 = pnand %p601_p5, %p595_p2 }
  0x34   :  { %486 = vmatpush3.bf16.msra.mxu0 %v537_v3  ;;  %522 = vmatpush3.bf16.msra.mxu1 %v537_v3 }
  0x35   :  { %487 = vmatprep.subr.bf16.mxu0 %v538_v6  ;;  %515 = vmatprep.subr.bf16.mxu1 %v538_v6 }
  0x38   :  { %488 = vmatpush3.bf16.msra.mxu0 %v538_v6  ;;  %523 = vmatpush3.bf16.msra.mxu1 %v538_v6 }
  0x39   :  { %489 = vmatprep.subr.bf16.mxu0 %v539_v7  ;;  %516 = vmatprep.subr.bf16.mxu1 %v539_v7 }
  0x3c   :  { %490 = vmatpush3.bf16.msra.mxu0 %v539_v7  ;;  %524 = vmatpush3.bf16.msra.mxu1 %v539_v7 }
  0x3d   :  { %491 = vmatprep.subr.bf16.mxu0 %v540_v8  ;;  %517 = vmatprep.subr.bf16.mxu1 %v540_v8 }
  0x40   :  { %492 = vmatpush3.bf16.msra.mxu0 %v540_v8  ;;  %525 = vmatpush3.bf16.msra.mxu1 %v540_v8 }
  0x41   :  { %493 = vmatprep.subr.bf16.mxu0 %v541_v9  ;;  %518 = vmatprep.subr.bf16.mxu1 %v541_v9 }
  0x44   :  { %494 = vmatpush3.bf16.msra.mxu0 %v541_v9  ;;  %526 = vmatpush3.bf16.msra.mxu1 %v541_v9 }
  0x47   :  { %496 = vmatmul.mubr.bf16.vlgmr.msra.gmra.mrb[0].mxu0 %v544_v10  ;;  %504 = vmatmul.mubr.bf16.vlgmr.msra.gmra.mrb[0].mxu1 %v545_v11 }
  0x48   :  { %499 = vmatprep.mubr.bf16.mxu0 %v546_v12  ;;  %507 = vmatprep.mubr.bf16.mxu1 %v547_v13 }
  0x4f   :  { %500 = vmatmul.mubr.bf16.gmra.mrb[4].mxu0 %v548_v14  ;;  %508 = vmatmul.mubr.bf16.gmra.mrb[4].mxu1 %v549_v15 }
 0x11a   :  { %v497_v23 = vpop.f32.mrb[0].mxu0  ;;  %v505_v24 = vpop.f32.mrb[0].mxu1 }
 0x11b   :  { %v363_v25 = vmul.f32 %v497_v23, %v360_v21  ;;  %v371_v26 = vmul.f32 %v505_v24, %v360_v21  ;;  %v242_v27 = vpop.f32.mrb[1].mxu0  ;;  %v274_v28 = vpop.f32.mrb[1].mxu1 }
 0x11c   :  { %v361_v29 = vmul.f32 %v360_v21, %v242_v27  ;;  %v369_v30 = vmul.f32 %v360_v21, %v274_v28  ;;  %v498_v31 = vpop.f32.mrb[2].mxu0  ;;  %v506_v32 = vpop.f32.mrb[2].mxu1 }
 0x11d   :  { %v383_v33 = vadd.f32 %v676_v22, %v363_v25  ;;  %v391_v34 = vadd.f32 %v676_v22, %v371_v26  ;;  %v364_v35 = vmul.f32 %v498_v31, %v360_v21  ;;  %v372_v36 = vmul.f32 %v506_v32, %v360_v21  ;;  %v245_v37 = vpop.f32.mrb[3].mxu0  ;;  %v277_v38 = vpop.f32.mrb[3].mxu1 }
 0x11e   :  { %v381_v39 = vadd.f32 %v676_v22, %v361_v29  ;;  %v389_v40 = vadd.f32 %v676_v22, %v369_v30  ;;  %v362_v41 = vmul.f32 %v360_v21, %v245_v37  ;;  %v370_v42 = vmul.f32 %v360_v21, %v277_v38 }
 0x11f   :  { %v399_v43 = vmax.f32 %v383_v33, 0.0  ;;  %v407_v44 = vmax.f32 %v391_v34, 0.0  ;;  %v384_v45 = vadd.f32 %v676_v22, %v364_v35  ;;  %v392_v46 = vadd.f32 %v676_v22, %v372_v36 }
 0x120   :  { %v397_v47 = vmax.f32 %v381_v39, 0.0  ;;  %v405_v48 = vmax.f32 %v389_v40, 0.0  ;;  %v382_v49 = vadd.f32 %v676_v22, %v362_v41  ;;  %v390_v50 = vadd.f32 %v676_v22, %v370_v42 }
 0x121   :  { %415 = vst [vmem:[#allocation8 + $0x10] sm:$0xff] %v399_v43  ;;  %423 = vst [vmem:[#allocation8 + $0x50] sm:$0xff] %v407_v44  ;;  %v400_v51 = vmax.f32 %v384_v45, 0.0  ;;  %v408_v52 = vmax.f32 %v392_v46, 0.0 }
 0x122   :  { %413 = vst [vmem:[#allocation8] sm:$0xff] %v397_v47  ;;  %421 = vst [vmem:[#allocation8 + $0x40] sm:$0xff] %v405_v48  ;;  %v398_v53 = vmax.f32 %v382_v49, 0.0  ;;  %v406_v54 = vmax.f32 %v390_v50, 0.0  ;;  %v501_v55 = vpop.f32.mrb[4].mxu0  ;;  %v509_v56 = vpop.f32.mrb[4].mxu1 }
 0x123   :  { %416 = vst [vmem:[#allocation8 + $0x18] sm:$0xff] %v400_v51  ;;  %424 = vst [vmem:[#allocation8 + $0x58] sm:$0xff] %v408_v52  ;;  %v367_v57 = vmul.f32 %v501_v55, %v360_v21  ;;  %v375_v58 = vmul.f32 %v509_v56, %v360_v21  ;;  %v258_v59 = vpop.f32.mrb[5].mxu0  ;;  %v290_v60 = vpop.f32.mrb[5].mxu1 }
 0x124   :  { %414 = vst [vmem:[#allocation8 + $0x8] sm:$0xff] %v398_v53  ;;  %422 = vst [vmem:[#allocation8 + $0x48] sm:$0xff] %v406_v54  ;;  %v365_v61 = vmul.f32 %v360_v21, %v258_v59  ;;  %v373_v62 = vmul.f32 %v360_v21, %v290_v60  ;;  %v502_v63 = vpop.f32.mrb[6].mxu0  ;;  %v510_v0 = vpop.f32.mrb[6].mxu1 }
 0x125   :  { %v387_v1 = vadd.f32 %v676_v22, %v367_v57  ;;  %v395_v2 = vadd.f32 %v676_v22, %v375_v58  ;;  %v368_v3 = vmul.f32 %v502_v63, %v360_v21  ;;  %v376_v4 = vmul.f32 %v510_v0, %v360_v21  ;;  %v261_v5 = vpop.f32.mrb[7].mxu0  ;;  %v293_v6 = vpop.f32.mrb[7].mxu1 }
 0x126   :  { %v385_v7 = vadd.f32 %v676_v22, %v365_v61  ;;  %v393_v8 = vadd.f32 %v676_v22, %v373_v62  ;;  %v366_v9 = vmul.f32 %v360_v21, %v261_v5  ;;  %v374_v10 = vmul.f32 %v360_v21, %v293_v6 }
 0x127   :  { %v403_v11 = vmax.f32 %v387_v1, 0.0  ;;  %v411_v12 = vmax.f32 %v395_v2, 0.0  ;;  %v388_v13 = vadd.f32 %v676_v22, %v368_v3  ;;  %v396_v14 = vadd.f32 %v676_v22, %v376_v4 }
 0x128   :  { %v401_v15 = vmax.f32 %v385_v7, 0.0  ;;  %v409_v16 = vmax.f32 %v393_v8, 0.0  ;;  %v386_v17 = vadd.f32 %v676_v22, %v366_v9  ;;  %v394_v18 = vadd.f32 %v676_v22, %v374_v10 }
 0x129   :  { %419 = vst [vmem:[#allocation8 + $0x30] sm:$0xff] %v403_v11  ;;  %427 = vst [vmem:[#allocation8 + $0x70] sm:$0xff] %v411_v12  ;;  %v404_v19 = vmax.f32 %v388_v13, 0.0  ;;  %v412_v20 = vmax.f32 %v396_v14, 0.0 }
 0x12a   :  { %417 = vst [vmem:[#allocation8 + $0x20] sm:$0xff] %v401_v15  ;;  %425 = vst [vmem:[#allocation8 + $0x60] sm:$0xff] %v409_v16  ;;  %v402_v21 = vmax.f32 %v386_v17, 0.0  ;;  %v410_v23 = vmax.f32 %v394_v18, 0.0 }
 0x12b   :  { %420 = vst [vmem:[#allocation8 + $0x38] sm:$0xff] %v404_v19  ;;  %428 = vst [vmem:[#allocation8 + $0x78] sm:$0xff] %v412_v20 }
 0x12c   :  { %418 = vst [vmem:[#allocation8 + $0x28] sm:$0xff] %v402_v21  ;;  %426 = vst [vmem:[#allocation8 + $0x68] sm:$0xff] %v410_v23 }
 0x12d   :  { %605 = shalt.err (!%p602_p6)
}
 0x12e   :  { %s606_s15 = scalar_lea.hbm %s709_s3, 2048 }
 0x12f   :  { %p607_p7 = scmp.ne.s32.totalorder %s709_s3, %s606_s15  ;;  %p610_p8 = scmp.lt.u32.totalorder %s606_s15, %s709_s3 }
 0x131   :  { %p612_p9 = pnand %p610_p8, %p607_p7 }
 0x133   :  { %615 = shalt.err (!%p612_p9)
}
 0x134   :  { %s627_s20 = smov 128   ;;  %s628_s21 = smov 8  }
 0x135   :  { %440 = dma.vmem_to_hbm [thread:$0]  %s435_s11, 2048, %s709_s3, [#allocation5], %s627_s20, %s627_s20, %s628_s21  }
 0x136   :  { %620 = dma.done.wait [#allocation5], 2048  }
 0x137   :  { %621 = vsyncadd [#allocation5], 4294965248 }
 0x138   :  { %444 = vsyncpa [#allocation4], 1 }
 0x139   :  { %445 = vsyncpa [#allocation7], 1 }
 0x13a   :  { %446 = vsyncpa [#allocation5], 1 }

</bundles_post_ra>
